<compile_context>
chip_gen: v7x
topology: tpu7x:2x2x1
jax: 0.10.0
libtpu: 0.0.40
codegen_flags: <defaults>
</compile_context>

<pallas_src>
from math import sqrt
from functools import partial

import jax
import jax.numpy as jnp
from jax import lax
from jax.experimental import pallas as pl
from jax.experimental.pallas import tpu as pltpu


# ----------------------------------------------------------------------------
# Fused AttentionLayer kernel
# ----------------------------------------------------------------------------

def _attention_layer_kernel(xq_ref, xk_ref, xv_ref,
                            wq_ref, bq_ref, wk_ref, bk_ref,
                            wv_ref, bv_ref, wo_ref, bo_ref,
                            out_ref, attn_ref,
                            *, n_heads, d_keys, d_values, scale):
    H, E, Dv = n_heads, d_keys, d_values

    xq = xq_ref[0]                       # (TL, d_model)
    xk = xk_ref[0]                       # (S,  d_model)
    xv = xv_ref[0]                       # (S,  d_model)

    # --- fused projections: full-width matmuls keep the MXU tile dense -------
    q = jnp.dot(xq, wq_ref[...], preferred_element_type=jnp.float32) + bq_ref[...]
    k = jnp.dot(xk, wk_ref[...], preferred_element_type=jnp.float32) + bk_ref[...]
    v = jnp.dot(xv, wv_ref[...], preferred_element_type=jnp.float32) + bv_ref[...]

    # Fold the 1/sqrt(E) scale into Q (TL x H*E elements instead of H x TL x S).
    q = q * scale

    wo = wo_ref[...]                     # (H*Dv, d_model)
    tl, d_model = out_ref.shape[1], out_ref.shape[2]
    acc = jnp.zeros((tl, d_model), dtype=jnp.float32)

    # Static unroll over heads; every matmul stays 2-D (robust Mosaic lowering).
    for h in range(H):
        qh = q[:, h * E:(h + 1) * E]             # (TL, E)
        kh = k[:, h * E:(h + 1) * E]             # (S,  E)
        vh = v[:, h * Dv:(h + 1) * Dv]           # (S,  Dv)

        # scores = qh @ kh^T, contracted on the last dims (no explicit transpose)
        s = lax.dot_general(qh, kh, (((1,), (1,)), ((), ())),
                            preferred_element_type=jnp.float32)       # (TL, S)

        m = jnp.max(s, axis=-1, keepdims=True)
        p = jnp.exp(s - m)
        denom = jnp.sum(p, axis=-1, keepdims=True)
        a = p * pl.reciprocal(denom, approx=True)                     # (TL, S)

        attn_ref[0, h, :, :] = a.astype(attn_ref.dtype)

        ctx = jnp.dot(a.astype(vh.dtype), vh,
                      preferred_element_type=jnp.float32)             # (TL, Dv)
        # Fused output projection slice for this head.
        acc = acc + jnp.dot(ctx, wo[h * Dv:(h + 1) * Dv, :],
                            preferred_element_type=jnp.float32)

    out_ref[0] = (acc + bo_ref[...]).astype(out_ref.dtype)


def _pick_l_tile(L):
    # Full L fits comfortably for typical Informer configs; tile larger L so the
    # per-step working set (incl. the (H, TL, S) attention tile) stays in VMEM.
    if L <= 256:
        return L
    for t in (256, 128, 64, 32, 16, 8):
        if L % t == 0:
            return t
    return L


def attention_layer_forward(params, queries, keys, values, attn_mask=None,
                            tau=None, delta=None, *, n_heads):
    # TODO(synk): attn_mask / tau / delta are accepted but unused (FullAttention
    # with mask_flag=False, as in the default Informer configuration).
    B, L, d_model = queries.shape
    _, S, _ = keys.shape
    H = n_heads

    wq, bq = params["q_proj"]
    wk, bk = params["k_proj"]
    wv, bv = params["v_proj"]
    wo, bo = params["o_proj"]

    HE = wq.shape[1]
    HD = wv.shape[1]
    E = HE // H
    Dv = HD // H
    scale = 1.0 / sqrt(E)

    TL = _pick_l_tile(L)
    nL = L // TL

    kernel = partial(_attention_layer_kernel,
                     n_heads=H, d_keys=E, d_values=Dv, scale=scale)

    # TODO(synk): for very long S (>=2k, esp. v7x's 64 MiB VMEM) the S axis
    # should also be tiled with an online-softmax accumulator; the full (L,S)
    # attention-map output required by output_attention=True makes that a
    # semantics change, so it is not done here.
    out, attn = pl.pallas_call(
        kernel,
        out_shape=(
            jax.ShapeDtypeStruct((B, L, d_model), queries.dtype),
            jax.ShapeDtypeStruct((B, H, L, S), jnp.float32),
        ),
        grid=(B, nL),
        in_specs=[
            pl.BlockSpec((1, TL, d_model), lambda b, l: (b, l, 0)),   # queries
            pl.BlockSpec((1, S, d_model), lambda b, l: (b, 0, 0)),    # keys
            pl.BlockSpec((1, S, d_model), lambda b, l: (b, 0, 0)),    # values
            pl.BlockSpec((d_model, HE), lambda b, l: (0, 0)),         # Wq (resident)
            pl.BlockSpec((1, HE), lambda b, l: (0, 0)),               # bq
            pl.BlockSpec((d_model, HE), lambda b, l: (0, 0)),         # Wk
            pl.BlockSpec((1, HE), lambda b, l: (0, 0)),               # bk
            pl.BlockSpec((d_model, HD), lambda b, l: (0, 0)),         # Wv
            pl.BlockSpec((1, HD), lambda b, l: (0, 0)),               # bv
            pl.BlockSpec((HD, d_model), lambda b, l: (0, 0)),         # Wo
            pl.BlockSpec((1, d_model), lambda b, l: (0, 0)),          # bo
        ],
        out_specs=(
            pl.BlockSpec((1, TL, d_model), lambda b, l: (b, l, 0)),
            pl.BlockSpec((1, H, TL, S), lambda b, l: (b, 0, l, 0)),
        ),
        compiler_params=pltpu.CompilerParams(
            dimension_semantics=("parallel", "parallel"),   # megacore on v7x
        ),
    )(queries, keys, values, wq, bq, wk, bk, wv, bv, wo, bo)

    return out, attn


# ----------------------------------------------------------------------------
# Parameter init (weights stored pre-transposed as (in, out); biases as (1, N))
# ----------------------------------------------------------------------------

def init_params(key, d_model, n_heads, d_keys=None, d_values=None):
    d_keys = d_keys or d_model // n_heads
    d_values = d_values or d_model // n_heads
    ks = jax.random.split(key, 8)

    def linear_init(kw, kb, fan_in, fan_out):
        bound = 1.0 / sqrt(fan_in)
        w = jax.random.uniform(kw, (fan_in, fan_out), jnp.float32, -bound, bound)
        b = jax.random.uniform(kb, (1, fan_out), jnp.float32, -bound, bound)
        return w, b

    return {
        "q_proj": linear_init(ks[0], ks[1], d_model, d_keys * n_heads),
        "k_proj": linear_init(ks[2], ks[3], d_model, d_keys * n_heads),
        "v_proj": linear_init(ks[4], ks[5], d_model, d_values * n_heads),
        "o_proj": linear_init(ks[6], ks[7], d_values * n_heads, d_model),
    }


# ----------------------------------------------------------------------------
# Reference (pure jnp) for sanity check
# ----------------------------------------------------------------------------

def reference_forward(params, queries, keys, values, *, n_heads):
    B, L, d_model = queries.shape
    _, S, _ = keys.shape
    H = n_heads

    def lin(name, x):
        w, b = params[name]
        return x @ w + b

    q = lin("q_proj", queries).reshape(B, L, H, -1)
    k = lin("k_proj", keys).reshape(B, S, H, -1)
    v = lin("v_proj", values).reshape(B, S, H, -1)
    E = q.shape[-1]
    scores = jnp.einsum("blhe,bshe->bhls", q, k) / sqrt(E)
    A = jax.nn.softmax(scores, axis=-1)
    out = jnp.einsum("bhls,bshd->blhd", A, v).reshape(B, L, -1)
    return lin("o_proj", out), A


# ----------------------------------------------------------------------------

if __name__ == "__main__":
    B, L, S = 2, 8, 8
    d_model, n_heads = 32, 4

    key = jax.random.PRNGKey(0)
    kp, kq, kk, kv = jax.random.split(key, 4)

    params = init_params(kp, d_model, n_heads)

    queries = jax.random.normal(kq, (B, L, d_model), jnp.float32)
    keys_in = jax.random.normal(kk, (B, S, d_model), jnp.float32)
    values_in = jax.random.normal(kv, (B, S, d_model), jnp.float32)

    out, attn = attention_layer_forward(
        params, queries, keys_in, values_in, attn_mask=None, n_heads=n_heads
    )
    out = jax.block_until_ready(out)
    attn = jax.block_until_ready(attn)

    ref_out, ref_attn = reference_forward(
        params, queries, keys_in, values_in, n_heads=n_heads
    )
    assert out.shape == (B, L, d_model)
    assert attn.shape == (B, n_heads, L, S)
    # approx reciprocal (EUP) in the softmax => slightly looser tolerance
    assert jnp.allclose(out, ref_out, atol=2e-3, rtol=2e-3)
    assert jnp.allclose(attn, ref_attn, atol=2e-3, rtol=2e-3)

    print("KERNEL_OK")
</pallas_src>

<mosaic_0001>
module attributes {stable_mosaic.version = 11 : i64} {
  func.func @_attention_layer_kernel(%arg0: i32, %arg1: i32, %arg2: memref<1x8x32xf32, #tpu.memory_space<vmem>>, %arg3: memref<1x8x32xf32, #tpu.memory_space<vmem>>, %arg4: memref<1x8x32xf32, #tpu.memory_space<vmem>>, %arg5: memref<32x32xf32, #tpu.memory_space<vmem>>, %arg6: memref<1x32xf32, #tpu.memory_space<vmem>>, %arg7: memref<32x32xf32, #tpu.memory_space<vmem>>, %arg8: memref<1x32xf32, #tpu.memory_space<vmem>>, %arg9: memref<32x32xf32, #tpu.memory_space<vmem>>, %arg10: memref<1x32xf32, #tpu.memory_space<vmem>>, %arg11: memref<32x32xf32, #tpu.memory_space<vmem>>, %arg12: memref<1x32xf32, #tpu.memory_space<vmem>>, %arg13: memref<1x8x32xf32, #tpu.memory_space<vmem>>, %arg14: memref<1x4x8x8xf32, #tpu.memory_space<vmem>>) attributes {dimension_semantics = [#tpu.dimension_semantics<parallel>, #tpu.dimension_semantics<parallel>], iteration_bounds = array<i64: 2, 1>, scalar_prefetch = 0 : i64, scratch_operands = 0 : i64, tpu.core_type = #tpu.core_type<tc>, window_params = [{transform_indices = @transform_0, window_bounds = array<i64: 1, 8, 32>}, {transform_indices = @transform_1, window_bounds = array<i64: 1, 8, 32>}, {transform_indices = @transform_2, window_bounds = array<i64: 1, 8, 32>}, {pipeline_mode = #tpu.pipeline_mode<synchronous>, transform_indices = @transform_3, window_bounds = array<i64: 32, 32>}, {pipeline_mode = #tpu.pipeline_mode<synchronous>, transform_indices = @transform_4, window_bounds = array<i64: 1, 32>}, {pipeline_mode = #tpu.pipeline_mode<synchronous>, transform_indices = @transform_5, window_bounds = array<i64: 32, 32>}, {pipeline_mode = #tpu.pipeline_mode<synchronous>, transform_indices = @transform_6, window_bounds = array<i64: 1, 32>}, {pipeline_mode = #tpu.pipeline_mode<synchronous>, transform_indices = @transform_7, window_bounds = array<i64: 32, 32>}, {pipeline_mode = #tpu.pipeline_mode<synchronous>, transform_indices = @transform_8, window_bounds = array<i64: 1, 32>}, {pipeline_mode = #tpu.pipeline_mode<synchronous>, transform_indices = @transform_9, window_bounds = array<i64: 32, 32>}, {pipeline_mode = #tpu.pipeline_mode<synchronous>, transform_indices = @transform_10, window_bounds = array<i64: 1, 32>}, {transform_indices = @transform_11, window_bounds = array<i64: 1, 8, 32>}, {transform_indices = @transform_12, window_bounds = array<i64: 1, 4, 8, 8>}]} {
    %c0 = arith.constant 0 : index
    %c0_0 = arith.constant 0 : index
    %c0_1 = arith.constant 0 : index
    %0 = vector.load %arg2[%c0, %c0_0, %c0_1] : memref<1x8x32xf32, #tpu.memory_space<vmem>>, vector<1x8x32xf32>
    %1 = vector.shape_cast %0 : vector<1x8x32xf32> to vector<8x32xf32>
    %c0_2 = arith.constant 0 : index
    %c0_3 = arith.constant 0 : index
    %c0_4 = arith.constant 0 : index
    %2 = vector.load %arg3[%c0_2, %c0_3, %c0_4] : memref<1x8x32xf32, #tpu.memory_space<vmem>>, vector<1x8x32xf32>
    %3 = vector.shape_cast %2 : vector<1x8x32xf32> to vector<8x32xf32>
    %c0_5 = arith.constant 0 : index
    %c0_6 = arith.constant 0 : index
    %c0_7 = arith.constant 0 : index
    %4 = vector.load %arg4[%c0_5, %c0_6, %c0_7] : memref<1x8x32xf32, #tpu.memory_space<vmem>>, vector<1x8x32xf32>
    %5 = vector.shape_cast %4 : vector<1x8x32xf32> to vector<8x32xf32>
    %c0_8 = arith.constant 0 : index
    %c0_9 = arith.constant 0 : index
    %6 = vector.load %arg5[%c0_8, %c0_9] : memref<32x32xf32, #tpu.memory_space<vmem>>, vector<32x32xf32>
    %cst = arith.constant dense<0.000000e+00> : vector<8x32xf32>
    %7 = tpu.matmul %1, %6, %cst {dimension_numbers = #tpu.dot_dimension_numbers<[1], [0], [0], [1], [0, 0, 1, 1], [], []>} : vector<8x32xf32>, vector<32x32xf32>, vector<8x32xf32> -> vector<8x32xf32>
    %c0_10 = arith.constant 0 : index
    %c0_11 = arith.constant 0 : index
    %8 = vector.load %arg6[%c0_10, %c0_11] : memref<1x32xf32, #tpu.memory_space<vmem>>, vector<1x32xf32>
    %9 = vector.broadcast %8 : vector<1x32xf32> to vector<8x32xf32>
    %10 = arith.addf %7, %9 : vector<8x32xf32>
    %c0_12 = arith.constant 0 : index
    %c0_13 = arith.constant 0 : index
    %11 = vector.load %arg7[%c0_12, %c0_13] : memref<32x32xf32, #tpu.memory_space<vmem>>, vector<32x32xf32>
    %cst_14 = arith.constant dense<0.000000e+00> : vector<8x32xf32>
    %12 = tpu.matmul %3, %11, %cst_14 {dimension_numbers = #tpu.dot_dimension_numbers<[1], [0], [0], [1], [0, 0, 1, 1], [], []>} : vector<8x32xf32>, vector<32x32xf32>, vector<8x32xf32> -> vector<8x32xf32>
    %c0_15 = arith.constant 0 : index
    %c0_16 = arith.constant 0 : index
    %13 = vector.load %arg8[%c0_15, %c0_16] : memref<1x32xf32, #tpu.memory_space<vmem>>, vector<1x32xf32>
    %14 = vector.broadcast %13 : vector<1x32xf32> to vector<8x32xf32>
    %15 = arith.addf %12, %14 : vector<8x32xf32>
    %c0_17 = arith.constant 0 : index
    %c0_18 = arith.constant 0 : index
    %16 = vector.load %arg9[%c0_17, %c0_18] : memref<32x32xf32, #tpu.memory_space<vmem>>, vector<32x32xf32>
    %cst_19 = arith.constant dense<0.000000e+00> : vector<8x32xf32>
    %17 = tpu.matmul %5, %16, %cst_19 {dimension_numbers = #tpu.dot_dimension_numbers<[1], [0], [0], [1], [0, 0, 1, 1], [], []>} : vector<8x32xf32>, vector<32x32xf32>, vector<8x32xf32> -> vector<8x32xf32>
    %c0_20 = arith.constant 0 : index
    %c0_21 = arith.constant 0 : index
    %18 = vector.load %arg10[%c0_20, %c0_21] : memref<1x32xf32, #tpu.memory_space<vmem>>, vector<1x32xf32>
    %19 = vector.broadcast %18 : vector<1x32xf32> to vector<8x32xf32>
    %20 = arith.addf %17, %19 : vector<8x32xf32>
    %cst_22 = arith.constant 0.353553385 : f32
    %21 = vector.broadcast %cst_22 : f32 to vector<8x32xf32>
    %22 = arith.mulf %10, %21 : vector<8x32xf32>
    %c0_23 = arith.constant 0 : index
    %c0_24 = arith.constant 0 : index
    %23 = vector.load %arg11[%c0_23, %c0_24] : memref<32x32xf32, #tpu.memory_space<vmem>>, vector<32x32xf32>
    %cst_25 = arith.constant 0.000000e+00 : f32
    %24 = vector.broadcast %cst_25 : f32 to vector<8x32xf32>
    %25 = vector.extract_strided_slice %22 {offsets = [0, 0], sizes = [8, 8], strides = [1, 1]} : vector<8x32xf32> to vector<8x8xf32>
    %26 = vector.extract_strided_slice %15 {offsets = [0, 0], sizes = [8, 8], strides = [1, 1]} : vector<8x32xf32> to vector<8x8xf32>
    %27 = vector.extract_strided_slice %20 {offsets = [0, 0], sizes = [8, 8], strides = [1, 1]} : vector<8x32xf32> to vector<8x8xf32>
    %cst_26 = arith.constant dense<0.000000e+00> : vector<8x8xf32>
    %28 = tpu.matmul %25, %26, %cst_26 {dimension_numbers = #tpu.dot_dimension_numbers<[1], [1], [0], [0], [0, 0, 1, 0], [], []>} : vector<8x8xf32>, vector<8x8xf32>, vector<8x8xf32> -> vector<8x8xf32>
    %cst_27 = arith.constant dense<0xFF800000> : vector<8xf32>
    %29 = vector.multi_reduction <maximumf>, %28, %cst_27 [1] : vector<8x8xf32> to vector<8xf32>
    %30 = vector.shape_cast %29 : vector<8xf32> to vector<8x1xf32>
    %31 = vector.broadcast %30 : vector<8x1xf32> to vector<8x8xf32>
    %32 = arith.subf %28, %31 : vector<8x8xf32>
    %33 = math.exp %32 : vector<8x8xf32>
    %cst_28 = arith.constant dense<0.000000e+00> : vector<8xf32>
    %34 = vector.multi_reduction <add>, %33, %cst_28 [1] : vector<8x8xf32> to vector<8xf32>
    %35 = vector.shape_cast %34 : vector<8xf32> to vector<8x1xf32>
    %36 = tpu.reciprocal %35 {approx = true} : vector<8x1xf32> -> vector<8x1xf32>
    %37 = vector.broadcast %36 : vector<8x1xf32> to vector<8x8xf32>
    %38 = arith.mulf %33, %37 : vector<8x8xf32>
    %c0_29 = arith.constant 0 : index
    %c0_30 = arith.constant 0 : index
    %c0_31 = arith.constant 0 : index
    %c0_32 = arith.constant 0 : index
    %39 = vector.load %arg14[%c0_29, %c0_30, %c0_31, %c0_32] : memref<1x4x8x8xf32, #tpu.memory_space<vmem>>, vector<1x1x8x8xf32>
    %40 = vector.shape_cast %39 : vector<1x1x8x8xf32> to vector<8x8xf32>
    %41 = vector.shape_cast %38 : vector<8x8xf32> to vector<1x1x8x8xf32>
    tpu.vector_store %arg14[%c0_29, %c0_30, %c0_31, %c0_32], %41 {strides = array<i32>} : memref<1x4x8x8xf32, #tpu.memory_space<vmem>>, vector<1x1x8x8xf32>,
    %cst_33 = arith.constant dense<0.000000e+00> : vector<8x8xf32>
    %42 = tpu.matmul %38, %27, %cst_33 {dimension_numbers = #tpu.dot_dimension_numbers<[1], [0], [0], [1], [0, 0, 1, 1], [], []>} : vector<8x8xf32>, vector<8x8xf32>, vector<8x8xf32> -> vector<8x8xf32>
    %43 = vector.extract_strided_slice %23 {offsets = [0, 0], sizes = [8, 32], strides = [1, 1]} : vector<32x32xf32> to vector<8x32xf32>
    %cst_34 = arith.constant dense<0.000000e+00> : vector<8x32xf32>
    %44 = tpu.matmul %42, %43, %cst_34 {dimension_numbers = #tpu.dot_dimension_numbers<[1], [0], [0], [1], [0, 0, 1, 1], [], []>} : vector<8x8xf32>, vector<8x32xf32>, vector<8x32xf32> -> vector<8x32xf32>
    %45 = arith.addf %24, %44 : vector<8x32xf32>
    %46 = vector.extract_strided_slice %22 {offsets = [0, 8], sizes = [8, 8], strides = [1, 1]} : vector<8x32xf32> to vector<8x8xf32>
    %47 = vector.extract_strided_slice %15 {offsets = [0, 8], sizes = [8, 8], strides = [1, 1]} : vector<8x32xf32> to vector<8x8xf32>
    %48 = vector.extract_strided_slice %20 {offsets = [0, 8], sizes = [8, 8], strides = [1, 1]} : vector<8x32xf32> to vector<8x8xf32>
    %cst_35 = arith.constant dense<0.000000e+00> : vector<8x8xf32>
    %49 = tpu.matmul %46, %47, %cst_35 {dimension_numbers = #tpu.dot_dimension_numbers<[1], [1], [0], [0], [0, 0, 1, 0], [], []>} : vector<8x8xf32>, vector<8x8xf32>, vector<8x8xf32> -> vector<8x8xf32>
    %cst_36 = arith.constant dense<0xFF800000> : vector<8xf32>
    %50 = vector.multi_reduction <maximumf>, %49, %cst_36 [1] : vector<8x8xf32> to vector<8xf32>
    %51 = vector.shape_cast %50 : vector<8xf32> to vector<8x1xf32>
    %52 = vector.broadcast %51 : vector<8x1xf32> to vector<8x8xf32>
    %53 = arith.subf %49, %52 : vector<8x8xf32>
    %54 = math.exp %53 : vector<8x8xf32>
    %cst_37 = arith.constant dense<0.000000e+00> : vector<8xf32>
    %55 = vector.multi_reduction <add>, %54, %cst_37 [1] : vector<8x8xf32> to vector<8xf32>
    %56 = vector.shape_cast %55 : vector<8xf32> to vector<8x1xf32>
    %57 = tpu.reciprocal %56 {approx = true} : vector<8x1xf32> -> vector<8x1xf32>
    %58 = vector.broadcast %57 : vector<8x1xf32> to vector<8x8xf32>
    %59 = arith.mulf %54, %58 : vector<8x8xf32>
    %c0_38 = arith.constant 0 : index
    %c1 = arith.constant 1 : index
    %c0_39 = arith.constant 0 : index
    %c0_40 = arith.constant 0 : index
    %60 = vector.load %arg14[%c0_38, %c1, %c0_39, %c0_40] : memref<1x4x8x8xf32, #tpu.memory_space<vmem>>, vector<1x1x8x8xf32>
    %61 = vector.shape_cast %60 : vector<1x1x8x8xf32> to vector<8x8xf32>
    %62 = vector.shape_cast %59 : vector<8x8xf32> to vector<1x1x8x8xf32>
    tpu.vector_store %arg14[%c0_38, %c1, %c0_39, %c0_40], %62 {strides = array<i32>} : memref<1x4x8x8xf32, #tpu.memory_space<vmem>>, vector<1x1x8x8xf32>,
    %cst_41 = arith.constant dense<0.000000e+00> : vector<8x8xf32>
    %63 = tpu.matmul %59, %48, %cst_41 {dimension_numbers = #tpu.dot_dimension_numbers<[1], [0], [0], [1], [0, 0, 1, 1], [], []>} : vector<8x8xf32>, vector<8x8xf32>, vector<8x8xf32> -> vector<8x8xf32>
    %64 = vector.extract_strided_slice %23 {offsets = [8, 0], sizes = [8, 32], strides = [1, 1]} : vector<32x32xf32> to vector<8x32xf32>
    %cst_42 = arith.constant dense<0.000000e+00> : vector<8x32xf32>
    %65 = tpu.matmul %63, %64, %cst_42 {dimension_numbers = #tpu.dot_dimension_numbers<[1], [0], [0], [1], [0, 0, 1, 1], [], []>} : vector<8x8xf32>, vector<8x32xf32>, vector<8x32xf32> -> vector<8x32xf32>
    %66 = arith.addf %45, %65 : vector<8x32xf32>
    %67 = vector.extract_strided_slice %22 {offsets = [0, 16], sizes = [8, 8], strides = [1, 1]} : vector<8x32xf32> to vector<8x8xf32>
    %68 = vector.extract_strided_slice %15 {offsets = [0, 16], sizes = [8, 8], strides = [1, 1]} : vector<8x32xf32> to vector<8x8xf32>
    %69 = vector.extract_strided_slice %20 {offsets = [0, 16], sizes = [8, 8], strides = [1, 1]} : vector<8x32xf32> to vector<8x8xf32>
    %cst_43 = arith.constant dense<0.000000e+00> : vector<8x8xf32>
    %70 = tpu.matmul %67, %68, %cst_43 {dimension_numbers = #tpu.dot_dimension_numbers<[1], [1], [0], [0], [0, 0, 1, 0], [], []>} : vector<8x8xf32>, vector<8x8xf32>, vector<8x8xf32> -> vector<8x8xf32>
    %cst_44 = arith.constant dense<0xFF800000> : vector<8xf32>
    %71 = vector.multi_reduction <maximumf>, %70, %cst_44 [1] : vector<8x8xf32> to vector<8xf32>
    %72 = vector.shape_cast %71 : vector<8xf32> to vector<8x1xf32>
    %73 = vector.broadcast %72 : vector<8x1xf32> to vector<8x8xf32>
    %74 = arith.subf %70, %73 : vector<8x8xf32>
    %75 = math.exp %74 : vector<8x8xf32>
    %cst_45 = arith.constant dense<0.000000e+00> : vector<8xf32>
    %76 = vector.multi_reduction <add>, %75, %cst_45 [1] : vector<8x8xf32> to vector<8xf32>
    %77 = vector.shape_cast %76 : vector<8xf32> to vector<8x1xf32>
    %78 = tpu.reciprocal %77 {approx = true} : vector<8x1xf32> -> vector<8x1xf32>
    %79 = vector.broadcast %78 : vector<8x1xf32> to vector<8x8xf32>
    %80 = arith.mulf %75, %79 : vector<8x8xf32>
    %c0_46 = arith.constant 0 : index
    %c2 = arith.constant 2 : index
    %c0_47 = arith.constant 0 : index
    %c0_48 = arith.constant 0 : index
    %81 = vector.load %arg14[%c0_46, %c2, %c0_47, %c0_48] : memref<1x4x8x8xf32, #tpu.memory_space<vmem>>, vector<1x1x8x8xf32>
    %82 = vector.shape_cast %81 : vector<1x1x8x8xf32> to vector<8x8xf32>
    %83 = vector.shape_cast %80 : vector<8x8xf32> to vector<1x1x8x8xf32>
    tpu.vector_store %arg14[%c0_46, %c2, %c0_47, %c0_48], %83 {strides = array<i32>} : memref<1x4x8x8xf32, #tpu.memory_space<vmem>>, vector<1x1x8x8xf32>,
    %cst_49 = arith.constant dense<0.000000e+00> : vector<8x8xf32>
    %84 = tpu.matmul %80, %69, %cst_49 {dimension_numbers = #tpu.dot_dimension_numbers<[1], [0], [0], [1], [0, 0, 1, 1], [], []>} : vector<8x8xf32>, vector<8x8xf32>, vector<8x8xf32> -> vector<8x8xf32>
    %85 = vector.extract_strided_slice %23 {offsets = [16, 0], sizes = [8, 32], strides = [1, 1]} : vector<32x32xf32> to vector<8x32xf32>
    %cst_50 = arith.constant dense<0.000000e+00> : vector<8x32xf32>
    %86 = tpu.matmul %84, %85, %cst_50 {dimension_numbers = #tpu.dot_dimension_numbers<[1], [0], [0], [1], [0, 0, 1, 1], [], []>} : vector<8x8xf32>, vector<8x32xf32>, vector<8x32xf32> -> vector<8x32xf32>
    %87 = arith.addf %66, %86 : vector<8x32xf32>
    %88 = vector.extract_strided_slice %22 {offsets = [0, 24], sizes = [8, 8], strides = [1, 1]} : vector<8x32xf32> to vector<8x8xf32>
    %89 = vector.extract_strided_slice %15 {offsets = [0, 24], sizes = [8, 8], strides = [1, 1]} : vector<8x32xf32> to vector<8x8xf32>
    %90 = vector.extract_strided_slice %20 {offsets = [0, 24], sizes = [8, 8], strides = [1, 1]} : vector<8x32xf32> to vector<8x8xf32>
    %cst_51 = arith.constant dense<0.000000e+00> : vector<8x8xf32>
    %91 = tpu.matmul %88, %89, %cst_51 {dimension_numbers = #tpu.dot_dimension_numbers<[1], [1], [0], [0], [0, 0, 1, 0], [], []>} : vector<8x8xf32>, vector<8x8xf32>, vector<8x8xf32> -> vector<8x8xf32>
    %cst_52 = arith.constant dense<0xFF800000> : vector<8xf32>
    %92 = vector.multi_reduction <maximumf>, %91, %cst_52 [1] : vector<8x8xf32> to vector<8xf32>
    %93 = vector.shape_cast %92 : vector<8xf32> to vector<8x1xf32>
    %94 = vector.broadcast %93 : vector<8x1xf32> to vector<8x8xf32>
    %95 = arith.subf %91, %94 : vector<8x8xf32>
    %96 = math.exp %95 : vector<8x8xf32>
    %cst_53 = arith.constant dense<0.000000e+00> : vector<8xf32>
    %97 = vector.multi_reduction <add>, %96, %cst_53 [1] : vector<8x8xf32> to vector<8xf32>
    %98 = vector.shape_cast %97 : vector<8xf32> to vector<8x1xf32>
    %99 = tpu.reciprocal %98 {approx = true} : vector<8x1xf32> -> vector<8x1xf32>
    %100 = vector.broadcast %99 : vector<8x1xf32> to vector<8x8xf32>
    %101 = arith.mulf %96, %100 : vector<8x8xf32>
    %c0_54 = arith.constant 0 : index
    %c3 = arith.constant 3 : index
    %c0_55 = arith.constant 0 : index
    %c0_56 = arith.constant 0 : index
    %102 = vector.load %arg14[%c0_54, %c3, %c0_55, %c0_56] : memref<1x4x8x8xf32, #tpu.memory_space<vmem>>, vector<1x1x8x8xf32>
    %103 = vector.shape_cast %102 : vector<1x1x8x8xf32> to vector<8x8xf32>
    %104 = vector.shape_cast %101 : vector<8x8xf32> to vector<1x1x8x8xf32>
    tpu.vector_store %arg14[%c0_54, %c3, %c0_55, %c0_56], %104 {strides = array<i32>} : memref<1x4x8x8xf32, #tpu.memory_space<vmem>>, vector<1x1x8x8xf32>,
    %cst_57 = arith.constant dense<0.000000e+00> : vector<8x8xf32>
    %105 = tpu.matmul %101, %90, %cst_57 {dimension_numbers = #tpu.dot_dimension_numbers<[1], [0], [0], [1], [0, 0, 1, 1], [], []>} : vector<8x8xf32>, vector<8x8xf32>, vector<8x8xf32> -> vector<8x8xf32>
    %106 = vector.extract_strided_slice %23 {offsets = [24, 0], sizes = [8, 32], strides = [1, 1]} : vector<32x32xf32> to vector<8x32xf32>
    %cst_58 = arith.constant dense<0.000000e+00> : vector<8x32xf32>
    %107 = tpu.matmul %105, %106, %cst_58 {dimension_numbers = #tpu.dot_dimension_numbers<[1], [0], [0], [1], [0, 0, 1, 1], [], []>} : vector<8x8xf32>, vector<8x32xf32>, vector<8x32xf32> -> vector<8x32xf32>
    %108 = arith.addf %87, %107 : vector<8x32xf32>
    %c0_59 = arith.constant 0 : index
    %c0_60 = arith.constant 0 : index
    %109 = vector.load %arg12[%c0_59, %c0_60] : memref<1x32xf32, #tpu.memory_space<vmem>>, vector<1x32xf32>
    %110 = vector.broadcast %109 : vector<1x32xf32> to vector<8x32xf32>
    %111 = arith.addf %108, %110 : vector<8x32xf32>
    %c0_61 = arith.constant 0 : index
    %c0_62 = arith.constant 0 : index
    %c0_63 = arith.constant 0 : index
    %112 = vector.load %arg13[%c0_61, %c0_62, %c0_63] : memref<1x8x32xf32, #tpu.memory_space<vmem>>, vector<1x8x32xf32>
    %113 = vector.shape_cast %112 : vector<1x8x32xf32> to vector<8x32xf32>
    %114 = vector.shape_cast %111 : vector<8x32xf32> to vector<1x8x32xf32>
    tpu.vector_store %arg13[%c0_61, %c0_62, %c0_63], %114 {strides = array<i32>} : memref<1x8x32xf32, #tpu.memory_space<vmem>>, vector<1x8x32xf32>,
    return
  }
  func.func @transform_0(%arg0: i32, %arg1: i32) -> (i32, i32, i32) {
    %c0_i32 = arith.constant 0 : i32
    %c0_i32_0 = arith.constant 0 : i32
    return %arg0, %arg1, %c0_i32 : i32, i32, i32
  }
  func.func @transform_1(%arg0: i32, %arg1: i32) -> (i32, i32, i32) {
    %c0_i32 = arith.constant 0 : i32
    %c0_i32_0 = arith.constant 0 : i32
    %c0_i32_1 = arith.constant 0 : i32
    return %arg0, %c0_i32, %c0_i32_0 : i32, i32, i32
  }
  func.func @transform_2(%arg0: i32, %arg1: i32) -> (i32, i32, i32) {
    %c0_i32 = arith.constant 0 : i32
    %c0_i32_0 = arith.constant 0 : i32
    %c0_i32_1 = arith.constant 0 : i32
    return %arg0, %c0_i32, %c0_i32_0 : i32, i32, i32
  }
  func.func @transform_3(%arg0: i32, %arg1: i32) -> (i32, i32) {
    %c0_i32 = arith.constant 0 : i32
    %c0_i32_0 = arith.constant 0 : i32
    %c0_i32_1 = arith.constant 0 : i32
    return %c0_i32, %c0_i32_0 : i32, i32
  }
  func.func @transform_4(%arg0: i32, %arg1: i32) -> (i32, i32) {
    %c0_i32 = arith.constant 0 : i32
    %c0_i32_0 = arith.constant 0 : i32
    %c0_i32_1 = arith.constant 0 : i32
    return %c0_i32, %c0_i32_0 : i32, i32
  }
  func.func @transform_5(%arg0: i32, %arg1: i32) -> (i32, i32) {
    %c0_i32 = arith.constant 0 : i32
    %c0_i32_0 = arith.constant 0 : i32
    %c0_i32_1 = arith.constant 0 : i32
    return %c0_i32, %c0_i32_0 : i32, i32
  }
  func.func @transform_6(%arg0: i32, %arg1: i32) -> (i32, i32) {
    %c0_i32 = arith.constant 0 : i32
    %c0_i32_0 = arith.constant 0 : i32
    %c0_i32_1 = arith.constant 0 : i32
    return %c0_i32, %c0_i32_0 : i32, i32
  }
  func.func @transform_7(%arg0: i32, %arg1: i32) -> (i32, i32) {
    %c0_i32 = arith.constant 0 : i32
    %c0_i32_0 = arith.constant 0 : i32
    %c0_i32_1 = arith.constant 0 : i32
    return %c0_i32, %c0_i32_0 : i32, i32
  }
  func.func @transform_8(%arg0: i32, %arg1: i32) -> (i32, i32) {
    %c0_i32 = arith.constant 0 : i32
    %c0_i32_0 = arith.constant 0 : i32
    %c0_i32_1 = arith.constant 0 : i32
    return %c0_i32, %c0_i32_0 : i32, i32
  }
  func.func @transform_9(%arg0: i32, %arg1: i32) -> (i32, i32) {
    %c0_i32 = arith.constant 0 : i32
    %c0_i32_0 = arith.constant 0 : i32
    %c0_i32_1 = arith.constant 0 : i32
    return %c0_i32, %c0_i32_0 : i32, i32
  }
  func.func @transform_10(%arg0: i32, %arg1: i32) -> (i32, i32) {
    %c0_i32 = arith.constant 0 : i32
    %c0_i32_0 = arith.constant 0 : i32
    %c0_i32_1 = arith.constant 0 : i32
    return %c0_i32, %c0_i32_0 : i32, i32
  }
  func.func @transform_11(%arg0: i32, %arg1: i32) -> (i32, i32, i32) {
    %c0_i32 = arith.constant 0 : i32
    %c0_i32_0 = arith.constant 0 : i32
    return %arg0, %arg1, %c0_i32 : i32, i32, i32
  }
  func.func @transform_12(%arg0: i32, %arg1: i32) -> (i32, i32, i32, i32) {
    %c0_i32 = arith.constant 0 : i32
    %c0_i32_0 = arith.constant 0 : i32
    %c0_i32_1 = arith.constant 0 : i32
    return %arg0, %c0_i32, %arg1, %c0_i32_0 : i32, i32, i32, i32
  }
}

</mosaic_0001>

<bundles_post_ra>
// kernel: tpu_custom_call.1
= control target key start
LH: loop header
LB: loop body
LE: loop exit
PB: predicated region body
PF: predicated region fallthrough
CT: control target
= control target key end

     0   :  { %s3350_s0 = inlined_call_operand.hbm [shape: f32[2,8,32], index: 0, kind: input, shape index: {}]   ;;  %s3351_s1 = inlined_call_operand.hbm [shape: f32[2,8,32], index: 1, kind: input, shape index: {}]   ;;  %s3352_s2 = inlined_call_operand.hbm [shape: f32[2,8,32], index: 2, kind: input, shape index: {}]   ;;  %s3353_s3 = inlined_call_operand.hbm [shape: f32[32,32], index: 3, kind: input, shape index: {}]   ;;  %s3354_s4 = inlined_call_operand.vmem [shape: f32[1,32], index: 4, kind: input, shape index: {}]   ;;  %s3355_s5 = inlined_call_operand.hbm [shape: f32[32,32], index: 5, kind: input, shape index: {}]   ;;  %s3356_s6 = inlined_call_operand.vmem [shape: f32[1,32], index: 6, kind: input, shape index: {}]   ;;  %s3357_s7 = inlined_call_operand.hbm [shape: f32[32,32], index: 7, kind: input, shape index: {}]   ;;  %s3358_s8 = inlined_call_operand.hbm [shape: f32[1,32], index: 8, kind: input, shape index: {}]   ;;  %s3359_s9 = inlined_call_operand.vmem [shape: f32[32,32], index: 9, kind: input, shape index: {}]   ;;  %s3360_s10 = inlined_call_operand.vmem [shape: f32[1,32], index: 10, kind: input, shape index: {}]   ;;  %s3361_s11 = inlined_call_operand.hbm [shape: f32[2,8,32], index: 11, kind: output, shape index: {0}]   ;;  %s3362_s12 = inlined_call_operand.hbm [shape: f32[2,4,8,8], index: 12, kind: output, shape index: {1}]  }
   0x1   :  { %3390 = sst [smem:[#allocation31_spill]] %s3351_s1 }
   0x2   :  { %3391 = sst [smem:[#allocation32_spill]] %s3353_s3 }
   0x3   :  { %3392 = sst [smem:[#allocation33_spill]] %s3357_s7 }
   0x4   :  { %3393 = sst [smem:[#allocation34_spill]] %s3359_s9 }
   0x5   :  { %3394 = sst [smem:[#allocation35_spill]] %s3360_s10 }
   0x6   :  { %3395 = sst [smem:[#allocation36_spill]] %s3361_s11 }
   0x7   :  { %3396 = sst [smem:[#allocation37_spill]] %s3362_s12 }
   0x8   :  { %18 = vsyncpa [#allocation3], 0 }
   0x9   :  { %20 = vsyncpa [#allocation3 + $0x1], 0 }
   0xa   :  { %21 = vsyncpa [#allocation6], 0 }
   0xb   :  { %23 = vsyncpa [#allocation6 + $0x1], 0 }
   0xc   :  { %24 = vsyncpa [#allocation9], 0 }
   0xd   :  { %25 = vsyncpa [#allocation12], 0 }
   0xe   :  { %26 = vsyncpa [#allocation4], 0 }
   0xf   :  { %28 = vsyncpa [#allocation4 + $0x1], 0 }
  0x10   :  { %29 = vsyncpa [#allocation16], 0 }
  0x11   :  { %31 = vsyncpa [#allocation16 + $0x1], 0  ;;  %s2812_s21 = smov 0   ;;  %s2814_s22 = smov 0  }
  0x12   :  { %s2816_s23 = smov 0   ;;  %s2818_s24 = smov 0  }
  0x13   :  { %s2820_s25 = smov 0   ;;  %s2822_s26 = smov 0  }
  0x14 LB: > { %3397 = sst [smem:[#allocation23_spill]] %s2706_s21  ;;  %s2843_s27 = sadd.s32 4294967295, %s2726_s26   ;;  %s2726_s26 = sphi %s2822_s26, %s37_s26   ;;  %s2722_s25 = sphi %s2820_s25, %s3445_s25   ;;  %s2718_s24 = sphi %s2818_s24, %s3444_s24   ;;  %s2714_s23 = sphi %s2816_s23, %s3448_s23   ;;  %s2710_s22 = sphi %s2814_s22, %s3447_s22   ;;  %s2706_s21 = sphi %s2812_s21, %s3446_s21  }
  0x15   : > { %3398 = sst [smem:[#allocation24_spill]] %s2718_s24  ;;  %p2048_p0 = scmp.ge.s32.totalorder %s2726_s26, 1 }
  0x16   : > { %3399 = sst [smem:[#allocation25_spill]] %s2722_s25  ;;  %p3374_p1 = scmp.eq.s32.totalorder %s2843_s27, 0 }
  0x17   : > { %3400 = sst [smem:[#allocation26_spill]] %s2726_s26  ;;  %p358_p2 = scmp.lt.s32.totalorder %s2726_s26, 3 }
  0x18   : > { %s2728_s29 = smov [#allocation8]   ;;  %s2729_s14 = smov [#allocation11]  }
  0x19   : > { %p2848_p3 = pnand %p2048_p0, %p358_p2  ;;  %s370_s30 = sshll.u32 %s2728_s29, 4  ;;  %s2852_s30 = int_to_ptr.vmem [resolvable:$true] %s370_s30 }
  0x1a   : > { %s402_s15 = sshll.u32 %s2729_s14, 4  ;;  %s3403_s3 = sld [smem:[#allocation32_spill]]  ;;  %s2863_s15 = int_to_ptr.vmem [resolvable:$true] %s402_s15 }
  0x1b   : > { %s3401_s28 = scalar_select %p2848_p3, 1, 0 }
  0x1c   : > { %p2280_p4 = pneg %p2848_p3 }
  0x1e   : > { %p2859_p6 = pnand %p2280_p4, %p3374_p1 }
  0x20   : > { %s3402_s13 = scalar_select %p2859_p6, 1, 0 }
  0x21   : > { %s2398_s18 = scalar_lea.hbm %s3403_s3, 512  ;;  %p2873_p8 = pneg %p2859_p6 }
  0x22   : > { %p2399_p7 = scmp.ne.s32.totalorder %s3403_s3, %s2398_s18  ;;  %p2405_p11 = scmp.lt.u32.totalorder %s2398_s18, %s3403_s3 }
  0x23   : > { %s3404_s29 = scalar_select %p2873_p8, 1, 0 }
  0x24   : > { %p2401_p9 = pnand %p2873_p8, %p2399_p7 }
  0x26   : > { %p2402_p10 = pneg %p2401_p9 }
  0x28   : > { %p2407_p12 = pnand %p2405_p11, %p2402_p10 }
  0x2a   : > { %2410 = shalt.err (!%p2407_p12)
}
  0x2b   : > { %s2411_s16 = scalar_lea.vmem %s2852_s30, 512  ;;  %p2419_p4 = scmp.lt.s32.totalorder %s2852_s30, %s2852_s30 }
  0x2c   : > { %p2412_p13 = scmp.ne.s32.totalorder %s2852_s30, %s2411_s16  ;;  %p2420_p5 = scmp.lt.s32.totalorder %s2411_s16, %s2411_s16 }
  0x2e   : > { %p2414_p0 = pnand %p2412_p13, %p2873_p8  ;;  %p2421_p7 = por %p2420_p5, %p2419_p4 }
  0x30   : > { %p2415_p2 = pneg %p2414_p0 }
  0x32   : > { %p2422_p9 = pnand %p2421_p7, %p2415_p2 }
  0x34   : > { %2425 = shalt.err (!%p2422_p9)
}
  0x35   : > { %s3367_s17 = smov 128   ;;  %s3368_s11 = smov 8  }
  0x36   : > { %2283 = dma.hbm_to_vmem [thread:$0]  (!%p2859_p6), %s3403_s3, 512, %s2852_s30, [#allocation9], %s3367_s17, %s3367_s17, %s3368_s11  }
  0x37   : > { %s3405_s7 = sld [smem:[#allocation33_spill]] }
  0x3d   : > { %s2426_s16 = scalar_lea.hbm %s3405_s7, 512 }
  0x3e   : > { %p2427_p5 = scmp.ne.s32.totalorder %s3405_s7, %s2426_s16  ;;  %p2433_p12 = scmp.lt.u32.totalorder %s2426_s16, %s3405_s7 }
  0x40   : > { %p2429_p10 = pnand %p2427_p5, %p2873_p8 }
  0x42   : > { %p2430_p11 = pneg %p2429_p10 }
  0x44   : > { %p2435_p13 = pnand %p2433_p12, %p2430_p11 }
  0x46   : > { %2438 = shalt.err (!%p2435_p13)
}
  0x47   : > { %s2439_s30 = scalar_lea.vmem %s2863_s15, 512  ;;  %p2447_p7 = scmp.lt.s32.totalorder %s2863_s15, %s2863_s15 }
  0x48   : > { %p2440_p0 = scmp.ne.s32.totalorder %s2863_s15, %s2439_s30  ;;  %p2448_p9 = scmp.lt.s32.totalorder %s2439_s30, %s2439_s30 }
  0x4a   : > { %p2442_p2 = pnand %p2440_p0, %p2873_p8  ;;  %p2449_p5 = por %p2448_p9, %p2447_p7 }
  0x4c   : > { %p2443_p4 = pneg %p2442_p2 }
  0x4e   : > { %p2450_p10 = pnand %p2449_p5, %p2443_p4 }
  0x50   : > { %2453 = shalt.err (!%p2450_p10)
}
  0x51   : > { %2289 = dma.hbm_to_vmem [thread:$0]  (!%p2859_p6), %s3405_s7, 512, %s2863_s15, [#allocation12], %s3367_s17, %s3367_s17, %s3368_s11  }
  0x52   : > { %s2047_s12 = sadd.s32 4294967294, %s2726_s26   ;;  %s49_s24 = sadd.s32 1, %s2722_s25 }
  0x53   : > { %p51_p11 = scmp.ge.s32.totalorder %s49_s24, 2  ;;  %s58_s18 = sadd.s32 1, %s2714_s23 }
  0x54   : > { %p65_p12 = scmp.ne.s32.totalorder %s2714_s23, %s2710_s22  ;;  %p66_p13 = scmp.eq.s32.totalorder %s2726_s26, 0 }
  0x55   : > { %s3450_s24 = smov (%p51_p11, %s49_s24), 0  ;;  %p71_p2 = scmp.ne.s32.totalorder %s2710_s22, %s2706_s21 }
  0x56   : > { %3406 = sst [smem:[#allocation27_spill]] %s3450_s24  ;;  %p2931_p0 = por %p66_p13, %p65_p12 }
  0x57   : > { %s53_s15 = ssub.s32 %s2722_s25, %s3450_s24  ;;  %p317_p4 = scmp.eq.s32.totalorder %s2843_s27, 1 }
  0x58   : > { %p56_p7 = scmp.eq.s32.totalorder %s53_s15, 0  ;;  %p2942_p9 = por %p3374_p1, %p71_p2 }
  0x59   : > { %p2946_p5 = por %p317_p4, %p65_p12  ;;  %p323_p10 = scmp.eq.s32.totalorder %s2047_s12, 1 }
  0x5a   : > { %s3408_s20 = scalar_select %p2942_p9, 1, 0 }
  0x5b   : > { %s3409_s14 = scalar_select %p2946_p5, 1, 0 }
  0x5c   : > { %s2951_s16 = scalar_select %p56_p7, %s2714_s23, %s58_s18  }
  0x5d   : > { %3410 = sst [smem:[#allocation28_spill]] %s3409_s14  ;;  %p2953_p11 = por %p323_p10, %p71_p2 }
  0x5e   : > { %3411 = sst [smem:[#allocation29_spill]] %s2951_s16  ;;  %p2314_p13 = scmp.lt.s32.totalorder %s2726_s26, 2 }
  0x5f   : > { %s3412_s30 = scalar_select %p2953_p11, 1, 0 }
  0x60   : > { %s3369_s9 = sand.u32 1, %s2714_s23   ;;  %s2960_s10 = sshll.u32 %s2722_s25, 7 }
  0x61   : > { %3413 = sst [smem:[#allocation30_spill]] %s3412_s30  ;;  %s2964_s15 = sshll.u32 %s3369_s9, 3 }
  0x62   : > { %p2968_p12 = pnand %p2314_p13, %p2931_p0  ;;  %s452_s12 = sand.u32 1, %s2726_s26  }
  0x63   : > { %s3415_s1 = sld [smem:[#allocation31_spill]]  ;;  %s456_s7 = scalar_lea.vmem [#allocation5], %s2964_s15 }
  0x64   : > { %s3414_s17 = scalar_select %p2968_p12, 1, 0 }
  0x65   : > { %s463_s9 = sshll.u32 %s456_s7, 4  ;;  %s2982_s19 = scalar_lea.sflag [#allocation6], %s452_s12  ;;  %s2980_s9 = int_to_ptr.vmem [resolvable:$true] %s463_s9 }
  0x66   : > { %p2988_p2 = pneg %p2968_p12 }
  0x68   : > { %s3416_s25 = scalar_select %p2988_p2, 1, 0 }
  0x69   : > { %s2977_s3 = scalar_lea.hbm %s3415_s1, %s2960_s10  ;;  %s2459_s16 = scalar_lea.hbm %s3415_s1, 256 }
  0x6a   : > { %s2454_s24 = scalar_lea.hbm %s2977_s3, 128  ;;  %p2460_p10 = scmp.lt.u32.totalorder %s2977_s3, %s3415_s1 }
  0x6b   : > { %p2455_p0 = scmp.ne.s32.totalorder %s2977_s3, %s2454_s24  ;;  %p2461_p13 = scmp.lt.u32.totalorder %s2459_s16, %s2454_s24 }
  0x6c   : > { %p2463_p11 = scmp.lt.u32.totalorder %s2454_s24, %s2977_s3 }
  0x6d   : > { %p2457_p4 = pnand %p2988_p2, %p2455_p0  ;;  %p2462_p1 = por %p2461_p13, %p2460_p10 }
  0x6f   : > { %p2458_p7 = pneg %p2457_p4  ;;  %p2464_p5 = por %p2463_p11, %p2462_p1 }
  0x71   : > { %p2465_p9 = pnand %p2464_p5, %p2458_p7 }
  0x73   : > { %2468 = shalt.err (!%p2465_p9)
}
  0x74   : > { %s2469_s12 = scalar_lea.vmem %s2980_s9, 128  ;;  %s2732_s11 = smov [#allocation5]  }
  0x75   : > { %p2470_p0 = scmp.ne.s32.totalorder %s2980_s9, %s2469_s12  ;;  %s2474_s18 = sshll.u32 %s2732_s11, 4  ;;  %s2475_s18 = int_to_ptr.vmem [resolvable:$false] %s2474_s18 }
  0x76   : > { %s2476_s26 = scalar_lea.vmem %s2475_s18, 256  ;;  %p2477_p6 = scmp.lt.s32.totalorder %s2980_s9, %s2475_s18 }
  0x77   : > { %p2472_p4 = pnand %p2470_p0, %p2988_p2  ;;  %p2478_p8 = scmp.lt.s32.totalorder %s2476_s26, %s2469_s12 }
  0x79   : > { %p2473_p3 = pneg %p2472_p4  ;;  %p2479_p10 = por %p2478_p8, %p2477_p6 }
  0x7b   : > { %p2480_p13 = pnand %p2479_p10, %p2473_p3 }
  0x7d   : > { %2483 = shalt.err (!%p2480_p13)
}
  0x7e   : > { %2299 = dma.hbm_to_vmem [thread:$0]  (!%p2968_p12), %s2977_s3, 128, %s2980_s9, %s2982_s19  }
  0x7f   : > { %s2733_s24 = smov [#allocation10]   ;;  %s2734_s7 = smov [#allocation13]  }
  0x80   : > { %s386_s16 = sshll.u32 %s2733_s24, 4  ;;  %s416_s1 = sshll.u32 %s2734_s7, 4  ;;  %s387_s16 = int_to_ptr.vmem [resolvable:$true] %s386_s16  ;;  %s417_s1 = int_to_ptr.vmem [resolvable:$true] %s416_s1 }
  0x81   : > { %s2484_s18 = scalar_lea.hbm %s3355_s5, 512  ;;  %p3417_p3 = scmp.ne.s32.totalorder %s3404_s29, 0 }
  0x82   : > { %p2485_p1 = scmp.ne.s32.totalorder %s3355_s5, %s2484_s18  ;;  %p2491_p9 = scmp.lt.u32.totalorder %s2484_s18, %s3355_s5 }
  0x84   : > { %p2487_p6 = pnand %p2485_p1, %p3417_p3 }
  0x86   : > { %p2488_p8 = pneg %p2487_p6 }
  0x88   : > { %p2493_p5 = pnand %p2491_p9, %p2488_p8 }
  0x8a   : > { %2496 = shalt.err (!%p2493_p5)
}
  0x8b   : > { %s2497_s3 = scalar_lea.vmem %s387_s16, 512  ;;  %p2505_p4 = scmp.lt.s32.totalorder %s387_s16, %s387_s16 }
  0x8c   : > { %p2498_p11 = scmp.ne.s32.totalorder %s387_s16, %s2497_s3  ;;  %p2506_p10 = scmp.lt.s32.totalorder %s2497_s3, %s2497_s3 }
  0x8e   : > { %p2500_p7 = pnand %p2498_p11, %p3417_p3  ;;  %p2507_p13 = por %p2506_p10, %p2505_p4 }
  0x90   : > { %p2501_p0 = pneg %p2500_p7 }
  0x92   : > { %p2508_p12 = pnand %p2507_p13, %p2501_p0 }
  0x94   : > { %2511 = shalt.err (!%p2508_p12)
}
  0x95   : > { %p3418_p1 = scmp.ne.s32.totalorder %s3402_s13, 0  ;;  %s3419_s30 = smov 8  }
  0x96   : > { %s3420_s9 = smov 128   ;;  %s2512_s11 = scalar_lea.hbm %s3358_s8, 16 }
  0x97   : > { %2286 = dma.hbm_to_vmem [thread:$0]  (!%p3418_p1), %s3355_s5, 512, %s387_s16, [#allocation9], %s3420_s9, %s3420_s9, %s3419_s30  }
  0x98   : > { %p2513_p6 = scmp.ne.s32.totalorder %s3358_s8, %s2512_s11  ;;  %p2519_p9 = scmp.lt.u32.totalorder %s2512_s11, %s3358_s8 }
  0x9a   : > { %p2515_p12 = pnand %p2513_p6, %p3417_p3 }
  0x9c   : > { %p2516_p8 = pneg %p2515_p12 }
  0x9e   : > { %p2521_p5 = pnand %p2519_p9, %p2516_p8 }
  0xa0   : > { %2524 = shalt.err (!%p2521_p5)
}
  0xa1   : > { %s2525_s21 = scalar_lea.vmem %s417_s1, 16  ;;  %s2532_s16 = scalar_lea.vmem %s417_s1, 32 }
  0xa2   : > { %p2526_p11 = scmp.ne.s32.totalorder %s417_s1, %s2525_s21  ;;  %p2533_p4 = scmp.lt.s32.totalorder %s417_s1, %s417_s1 }
  0xa3   : > { %p2534_p10 = scmp.lt.s32.totalorder %s2532_s16, %s2525_s21 }
  0xa4   : > { %p2528_p7 = pnand %p2526_p11, %p3417_p3 }
  0xa5   : > { %p2535_p13 = por %p2534_p10, %p2533_p4 }
  0xa6   : > { %p2529_p0 = pneg %p2528_p7 }
  0xa8   : > { %p2536_p2 = pnand %p2535_p13, %p2529_p0 }
  0xaa   : > { %2539 = shalt.err (!%p2536_p2)
}
  0xab   : > { %2292 = dma.hbm_to_vmem [thread:$0]  (!%p3418_p1), %s3358_s8, 16, %s417_s1, [#allocation12]  }
  0xac   : > { %s3055_s24 = scalar_lea.hbm %s3350_s0, %s2960_s10  ;;  %s437_s7 = scalar_lea.vmem [#allocation2], %s2964_s15 }
  0xad   : > { %s445_s13 = sshll.u32 %s437_s7, 4  ;;  %s3064_s12 = scalar_lea.hbm %s3352_s2, %s2960_s10  ;;  %s3058_s13 = int_to_ptr.vmem [resolvable:$true] %s445_s13 }
  0xae   : > { %s3421_s26 = sand.u32 1, %s2714_s23   ;;  %s2540_s3 = scalar_lea.hbm %s3055_s24, 128 }
  0xaf   : > { %s434_s1 = scalar_lea.sflag [#allocation3], %s3421_s26  ;;  %p2541_p2 = scmp.ne.s32.totalorder %s3055_s24, %s2540_s3 }
  0xb0   : > { %p3422_p3 = scmp.ne.s32.totalorder %s3416_s25, 0  ;;  %s2545_s30 = scalar_lea.hbm %s3350_s0, 256 }
  0xb1   : > { %p2546_p12 = scmp.lt.u32.totalorder %s3055_s24, %s3350_s0  ;;  %p2547_p8 = scmp.lt.u32.totalorder %s2545_s30, %s2540_s3 }
  0xb2   : > { %p2543_p1 = pnand %p2541_p2, %p3422_p3  ;;  %p2549_p5 = scmp.lt.u32.totalorder %s2540_s3, %s3055_s24 }
  0xb3   : > { %p2548_p9 = por %p2547_p8, %p2546_p12 }
  0xb4   : > { %p2544_p6 = pneg %p2543_p1 }
  0xb5   : > { %p2550_p11 = por %p2549_p5, %p2548_p9 }
  0xb7   : > { %p2551_p7 = pnand %p2550_p11, %p2544_p6 }
  0xb9   : > { %2554 = shalt.err (!%p2551_p7)
}
  0xba   : > { %s2555_s10 = scalar_lea.vmem %s3058_s13, 128  ;;  %s2735_s14 = smov [#allocation2]  }
  0xbb   : > { %p2556_p0 = scmp.ne.s32.totalorder %s3058_s13, %s2555_s10  ;;  %s2560_s7 = sshll.u32 %s2735_s14, 4  ;;  %s2561_s7 = int_to_ptr.vmem [resolvable:$false] %s2560_s7 }
  0xbc   : > { %s2562_s11 = scalar_lea.vmem %s2561_s7, 256  ;;  %p2563_p13 = scmp.lt.s32.totalorder %s3058_s13, %s2561_s7 }
  0xbd   : > { %p2558_p4 = pnand %p2556_p0, %p3422_p3  ;;  %p2564_p2 = scmp.lt.s32.totalorder %s2562_s11, %s2555_s10 }
  0xbf   : > { %p2559_p10 = pneg %p2558_p4  ;;  %p2565_p1 = por %p2564_p2, %p2563_p13 }
  0xc1   : > { %p2566_p12 = pnand %p2565_p1, %p2559_p10 }
  0xc3   : > { %2569 = shalt.err (!%p2566_p12)
}
  0xc4   : > { %p3423_p6 = scmp.ne.s32.totalorder %s3414_s17, 0  ;;  %s474_s18 = scalar_lea.vmem [#allocation7], %s2964_s15 }
  0xc5   : > { %s481_s26 = sshll.u32 %s474_s18, 4  ;;  %s2570_s3 = scalar_lea.hbm %s3064_s12, 128  ;;  %s482_s26 = int_to_ptr.vmem [resolvable:$true] %s481_s26 }
  0xc6   : > { %2296 = dma.hbm_to_vmem [thread:$0]  (!%p3423_p6), %s3055_s24, 128, %s3058_s13, %s434_s1  }
  0xc7   : > { %p2571_p8 = scmp.ne.s32.totalorder %s3064_s12, %s2570_s3  ;;  %s2575_s30 = scalar_lea.hbm %s3352_s2, 256 }
  0xc8   : > { %p2576_p11 = scmp.lt.u32.totalorder %s3064_s12, %s3352_s2  ;;  %p2577_p7 = scmp.lt.u32.totalorder %s2575_s30, %s2570_s3 }
  0xc9   : > { %p2573_p9 = pnand %p2571_p8, %p3422_p3  ;;  %p2579_p4 = scmp.lt.u32.totalorder %s2570_s3, %s3064_s12 }
  0xca   : > { %p2578_p0 = por %p2577_p7, %p2576_p11 }
  0xcb   : > { %p2574_p5 = pneg %p2573_p9 }
  0xcc   : > { %p2580_p10 = por %p2579_p4, %p2578_p0 }
  0xce   : > { %p2581_p13 = pnand %p2580_p10, %p2574_p5 }
  0xd0   : > { %2584 = shalt.err (!%p2581_p13)
}
  0xd1   : > { %s2585_s15 = scalar_lea.vmem %s482_s26, 128  ;;  %s2736_s24 = smov [#allocation7]  }
  0xd2   : > { %p2586_p2 = scmp.ne.s32.totalorder %s482_s26, %s2585_s15  ;;  %s2590_s13 = sshll.u32 %s2736_s24, 4  ;;  %s2591_s13 = int_to_ptr.vmem [resolvable:$false] %s2590_s13 }
  0xd3   : > { %s2592_s1 = scalar_lea.vmem %s2591_s13, 256  ;;  %p2593_p8 = scmp.lt.s32.totalorder %s482_s26, %s2591_s13 }
  0xd4   : > { %p2588_p1 = pnand %p2586_p2, %p3422_p3  ;;  %p2594_p9 = scmp.lt.s32.totalorder %s2592_s1, %s2585_s15 }
  0xd6   : > { %p2589_p12 = pneg %p2588_p1  ;;  %p2595_p6 = por %p2594_p9, %p2593_p8 }
  0xd8   : > { %p2596_p7 = pnand %p2595_p6, %p2589_p12 }
  0xda   : > { %2599 = shalt.err (!%p2596_p7)
}
  0xdb   : > { %p3424_p11 = scmp.ne.s32.totalorder %s3414_s17, 0  ;;  %p3425_p5 = scmp.ne.s32.totalorder %s3401_s28, 0 }
  0xdc   : > { %s3111_s25 = sand.u32 (!%p3425_p5), 1, %s2710_s22   ;;  %p3426_p3 = scmp.ne.s32.totalorder (!%p3425_p5), %s3408_s20, 0 }
  0xdd   : > { %2302 = dma.hbm_to_vmem [thread:$0]  (!%p3424_p11), %s3064_s12, 128, %s482_s26, %s2982_s19  }
  0xde   : > { %490 = sbr.rel (%p3425_p5) target bundleno = 2824 (0xb08), region = 64  ;;  %s3114_s10 = sshll.u32 (!%p3425_p5), %s3111_s25, 3 }
  0xdf   : > { %s493_s14 = scalar_lea.sflag (!%p3425_p5), [#allocation3], %s3111_s25  ;;  %s496_s7 = scalar_lea.vmem (!%p3425_p5), [#allocation2], %s3114_s10 }
  0xe5   : > { %2681 = dma.done.wait (%p3426_p3), %s493_s14, 128  }
  0xe6   : > { %2683 = vsyncadd (%p3426_p3), %s493_s14, 4294967168  ;;  %s501_s28 = sand.u32 1, %s2843_s27   ;;  %s505_s19 = scalar_lea.vmem [#allocation5], %s3114_s10 }
  0xe7   : > { %s502_s17 = scalar_lea.sflag [#allocation6], %s501_s28 }
  0xe8   : > { %2685 = dma.done.wait (%p3426_p3), %s502_s17, 256  }
  0xe9   : > { %2687 = vsyncadd (%p3426_p3), %s502_s17, 4294967040  ;;  %s514_s12 = scalar_lea.vmem [#allocation7], %s3114_s10  ;;  %p3427_p6 = scmp.eq.s32.totalorder %s2843_s27, 0 }
  0xeb   : > { %2689 = dma.done.wait (%p3427_p6), [#allocation9], 1024   ;;  %p3428_p0 = pmov %p3427_p6 }
  0xed   : > { %2691 = vsyncadd (%p3428_p0), [#allocation9], 4294966272  ;;  %p3429_p4 = pmov %p3428_p0 }
  0xee   : > { %p3430_p10 = pmov %p3428_p0 }
  0xef   : > { %2693 = dma.done.wait (%p3429_p4), [#allocation12], 528  }
  0xf0   : > { %2695 = vsyncadd (%p3430_p10), [#allocation12], 4294966768  ;;  %v2737_v0 = vmov 0.0|0.0   ;;  %vm2738_vm0 = vmmov 0   ;;  %v2739_v1 = vmov 0.0   ;;  %v674_v2 = vld [vmem:[#allocation10] sm:$0xff] }
  0xf1   : > { %2242 = vmatprep.subr.bf16.mxu1 %v2737_v0  ;;  %2236 = vmatprep.subr.bf16.mxu0 %v2737_v0  ;;  %v675_v3 = vld [vmem:[#allocation10 + $0x8] sm:$0xff]  ;;  %v589_v4 = vld [vmem:[#allocation8] sm:$0xff]  ;;  %v676_v7 = vld [vmem:[#allocation10 + $0x10] sm:$0xff]  ;;  %vm600_vm1 = vcmask 261120   ;;  %vm847_vm2 = vcmask 64512   ;;  %s2740_s26 = smov 120  }
  0xf2   : > { %2162 = vmatprep.mubr.msk.f32.mxu1 %vm2738_vm0, %v2739_v1  ;;  %2151 = vmatprep.mubr.msk.f32.mxu0 %vm2738_vm0, %v2739_v1  ;;  %v2243_v5 = vpack.c.bf16 %v675_v3, %v674_v2  ;;  %v590_v6 = vld [vmem:[#allocation8 + $0x8] sm:$0xff]  ;;  %v677_v8 = vld [vmem:[#allocation10 + $0x18] sm:$0xff]  ;;  %v591_v10 = vld [vmem:[#allocation8 + $0x10] sm:$0xff]  ;;  %s2741_s3 = smov 112   ;;  %s2742_s21 = smov 104  }
  0xf3   : > { %v2237_v9 = vpack.c.bf16 %v590_v6, %v589_v4  ;;  %v592_v11 = vld [vmem:[#allocation8 + $0x18] sm:$0xff]  ;;  %v2246_v12 = vpack.c.bf16 %v677_v8, %v676_v7  ;;  %v587_v14 = vld [vmem:[%s505_s19] sm:$0xff]  ;;  %v760_v18 = vld [vmem:[#allocation11 + $0x10] sm:$0xff]  ;;  %s2069_s16 = sshll.u32 %s3111_s25, 5  ;;  %s3431_s15 = sld [smem:[#allocation34_spill]] }
  0xf4   : > { %2244 = vmatpush3.bf16.msra.mxu1 %v2243_v5  ;;  %v2240_v13 = vpack.c.bf16 %v592_v11, %v591_v10  ;;  %v586_v15 = vld [vmem:[%s496_s7] sm:$0xff]  ;;  %v758_v16 = vld [vmem:[#allocation11] sm:$0xff]  ;;  %v759_v17 = vld [vmem:[#allocation11 + $0x8] sm:$0xff]  ;;  %s3194_s30 = scalar_lea.vmem [#allocation15], %s2069_s16  ;;  %s3432_s17 = sld [smem:[#allocation24_spill]] }
  0xf5   : > { %2238 = vmatpush3.bf16.msra.mxu0 %v2237_v9  ;;  %2245 = vmatprep.subr.bf16.mxu1 %v2737_v0  ;;  %v2249_v19 = vpack.c.bf16 %v759_v17, %v758_v16  ;;  %v761_v20 = vld [vmem:[#allocation11 + $0x18] sm:$0xff]  ;;  %v2072_v23 = vld [vmem:[%s3356_s6] ss:$0 sm:$0xff]  ;;  %v2074_v34 = vld [vmem:[#allocation13] ss:$0 sm:$0xff]  ;;  %s3433_s19 = sld [smem:[#allocation28_spill]] }
  0xf6   : > { %2239 = vmatprep.subr.bf16.mxu0 %v2737_v0  ;;  %v2252_v21 = vpack.c.bf16 %v761_v20, %v760_v18  ;;  %v588_v22 = vld [vmem:[%s514_s12] sm:$0xff]  ;;  %s1848_s27 = sshll.u32 %s3194_s30, 4  ;;  %s3434_s18 = sld [smem:[#allocation37_spill]]  ;;  %s3266_s27 = int_to_ptr.vmem [resolvable:$true] %s1848_s27 }
  0xf7   : > { %v2070_v24 = vld [vmem:[%s3354_s4] ss:$0 sm:$0xff]  ;;  %s2743_s16 = smov [#allocation15]  }
  0xf8   : > { %2247 = vmatpush3.bf16.msra.mxu1 %v2246_v12  ;;  %s2604_s9 = sshll.u32 %s2743_s16, 4  ;;  %s2605_s9 = int_to_ptr.vmem [resolvable:$false] %s2604_s9 }
  0xf9   : > { %2241 = vmatpush3.bf16.msra.mxu0 %v2240_v13  ;;  %2176 = vmatprep.subr.mxu1 %v2739_v1  ;;  %v844_v57 = vld [vmem:[%s3431_s15 + $0x8] sm:$0xff]  ;;  %v843_v62 = vld [vmem:[%s3431_s15] sm:$0xff]  ;;  %p2607_p8 = scmp.lt.s32.totalorder %s3266_s27, %s2605_s9 }
  0xfa   : > { %2248 = vmatprep.subr.bf16.mxu0 %v2737_v0  ;;  %s2103_s12 = sshll.u32 %s3432_s17, 9 }
  0xfb   : > { %2163 = vmatmul.mubr.msk.f32.vlgmr.msra.gmra.mrb[0].mxu1 %vm600_vm1, %v587_v14  ;;  %p3435_p2 = scmp.ne.s32.totalorder %s3433_s19, 0 }
  0xfc   : > { %2152 = vmatmul.mubr.msk.f32.vlgmr.msra.gmra.mrb[0].mxu0 %vm600_vm1, %v586_v15  ;;  %2178 = vmatprep.mubr.msk.f32.mxu1 %vm2738_vm0, %v2739_v1 }
  0xfd   : > { %2173 = vmatprep.mubr.msk.f32.mxu0 %vm2738_vm0, %v2739_v1  ;;  %2250 = vmatpush3.bf16.msra.mxu0 %v2249_v19 }
  0xfe   : > { %2251 = vmatprep.subr.bf16.mxu0 %v2737_v0 }
 0x101   : > { %2253 = vmatpush3.bf16.msra.mxu0 %v2252_v21 }
 0x102   : > { %2186 = vmatprep.subr.mxu0 %v2739_v1 }
 0x104   : > { %2174 = vmatmul.mubr.msk.f32.vlgmr.msra.gmra.mrb[2].mxu0 %vm600_vm1, %v588_v22 }
 0x105   : > { %2188 = vmatprep.mubr.msk.f32.mxu0 %vm2738_vm0, %v2739_v1 }
 0x1ce   : > { %v754_v25 = vpop.f32.mrb[0].mxu1 }
 0x1cf   : > { %v755_v26 = vadd.f32 %v2072_v23, %v754_v25  ;;  %v670_v27 = vpop.f32.mrb[0].mxu0  ;;  %v2164_v28 = vpop.f32.mrb[1].mxu1  ;;  %v845_v25 = vld [vmem:[%s3431_s15 + $0x10] sm:$0xff] }
 0x1d0   : > { %v671_v29 = vadd.f32 %v2070_v24, %v670_v27  ;;  %v2153_v30 = vpop.f32.mrb[1].mxu0 }
 0x1d1   : > { %1011 = vrot.lane.b32.xlu0 %v755_v26, %s2740_s26  ;;  %2177 = vmatpush3.xpose.msk.msra.mxu1 %vm847_vm2, %v755_v26 }
 0x1d2   : > { %v3166_v31 = vmul.f32 0.35355338, %v671_v29  ;;  %2181 = vmatprep.subr.mxu1 %v2739_v1 }
 0x1d4   : > { %2179 = vmatmul.mubr.msk.f32.vlgmr.msra.gmra.mrb[2].mxu1 %vm847_vm2, %v3166_v31 }
 0x1d5   : > { %1009 = vrot.lane.b32.xlu0 %v3166_v31, %s2740_s26  ;;  %2183 = vmatprep.mubr.msk.f32.mxu1 %vm2738_vm0, %v2739_v1 }
 0x1d7   : > { %v838_v35 = vpop.f32.mrb[2].mxu0 }
 0x1d8   : > { %v3180_v36 = vadd.f32 %v2074_v34, %v838_v35  ;;  %v2175_v37 = vpop.f32.mrb[3].mxu0 }
 0x1da   : > { %2182 = vmatpush3.msra.mxu1 %v3180_v36 }
 0x1db   : > { %2191 = vmatprep.subr.mxu1 %v2739_v1 }
 0x243   : > { %v1012_v32 = vpop.permute.xlu0 %1011 }
 0x244   : > { %2187 = vmatpush3.xpose.msk.msra.mxu0 %vm847_vm2, %v1012_v32 }
 0x245   : > { %2196 = vmatprep.subr.mxu0 %v2739_v1 }
 0x247   : > { %v1010_v33 = vpop.permute.xlu0 %1009 }
 0x248   : > { %2189 = vmatmul.mubr.msk.f32.vlgmr.msra.gmra.mrb[4].mxu0 %vm847_vm2, %v1010_v33 }
 0x249   : > { %2198 = vmatprep.mubr.msk.f32.mxu0 %vm2738_vm0, %v2739_v1  ;;  %2197 = vmatpush3.msra.mxu0 %v844_v57 }
 0x24a   : > { %2206 = vmatprep.subr.mxu0 %v2739_v1 }
 0x2a7   : > { %v920_v38 = vpop.f32.mrb[2].mxu1 }
 0x2a8   : > { %v2180_v39 = vpop.f32.mrb[3].mxu1  ;;  %v924_v40 = vsel %vm847_vm2, %v920_v38, -inf }
 0x2a9   : > { %925 = vmax.xlane.f32.xlu1 %v924_v40 }
 0x31b   : > { %v1083_v41 = vpop.f32.mrb[4].mxu0 }
 0x31c   : > { %v2190_v42 = vpop.f32.mrb[5].mxu0  ;;  %v1087_v43 = vsel %vm847_vm2, %v1083_v41, -inf }
 0x31d   : > { %1088 = vmax.xlane.f32.xlu1 %v1087_v43 }
 0x336   : > { %v926_v44 = vpop.xlane.xlu1 %925 }
 0x337   : > { %v927_v45 = vsub.f32 %v920_v38, %v926_v44 }
 0x339   : > { %v928_v46 = vmul.f32 1.442695, %v927_v45 }
 0x33b   : > { %2382 = vpow2.f32 %v928_v46 }
 0x345   : > { %v2383_v47 = vpop.eup %2382 }
 0x346   : > { %v930_v48 = vsel %vm847_vm2, %v2383_v47, 0.0 }
 0x347   : > { %931 = vadd.xlane.f32.xlu0 %v930_v48 }
 0x35d   : > { %1414 = vrot.lane.b32.xlu0 %v3180_v36, %s2741_s3 }
 0x361   : > { %1566 = vrot.lane.b32.xlu0 %v755_v26, %s2742_s21 }
 0x3aa   : > { %v1089_v49 = vpop.xlane.xlu1 %1088 }
 0x3ab   : > { %v1090_v50 = vsub.f32 %v1083_v41, %v1089_v49 }
 0x3ad   : > { %v1091_v51 = vmul.f32 1.442695, %v1090_v50 }
 0x3af   : > { %2384 = vpow2.f32 %v1091_v51 }
 0x3b9   : > { %v2385_v52 = vpop.eup %2384 }
 0x3ba   : > { %v1093_v53 = vsel %vm847_vm2, %v2385_v52, 0.0 }
 0x3bb   : > { %1094 = vadd.xlane.f32.xlu1 %v1093_v53 }
 0x3cc   : > { %1101 = vrot.lane.b32.xlu1 %v3180_v36, %s2740_s26  ;;  %s3264_s26 = scalar_lea.hbm %s3434_s18, %s2103_s12 }
 0x3d0   : > { %1325 = vrot.lane.b32.xlu1 %v755_v26, %s2741_s3 }
 0x3d4   : > { %v932_v54 = vpop.xlane.xlu0 %931  ;;  %1323 = vrot.lane.b32.xlu1 %v3166_v31, %s2741_s3  ;;  %s1820_s3 = scalar_lea.sflag [#allocation16], %s3111_s25 }
 0x3d5   : > { %2386 = vrcp.f32 %v932_v54 }
 0x3d8   : > { %v1415_v0 = vpop.permute.xlu0 %1414 }
 0x3dc   : > { %v1567_v20 = vpop.permute.xlu0 %1566 }
 0x3df   : > { %v2387_v55 = vpop.eup %2386 }
 0x3e0   : > { %v934_v56 = vmul.f32 %v2387_v55, %v2383_v47 }
 0x3e2   : > { %935 = vst.msk [vmem:[%s3194_s30] sm:$0xff] %vm847_vm2, %v934_v56  ;;  %2184 = vmatmul.mubr.msk.f32.vlgmr.msra.gmra.mrb[4].mxu1 %vm847_vm2, %v934_v56 }
 0x3e3   : > { %2193 = vmatprep.mubr.msk.f32.mxu1 %vm2738_vm0, %v2739_v1 }
 0x448   : > { %v1095_v58 = vpop.xlane.xlu1 %1094 }
 0x449   : > { %2388 = vrcp.f32 %v1095_v58 }
 0x44c   : > { %v1102_v59 = vpop.permute.xlu1 %1101 }
 0x44d   : > { %2192 = vmatpush3.msra.mxu1 %v1102_v59 }
 0x44e   : > { %2201 = vmatprep.subr.mxu1 %v2739_v1 }
 0x450   : > { %v1326_v3 = vpop.permute.xlu1 %1325 }
 0x453   : > { %v2389_v60 = vpop.eup %2388 }
 0x454   : > { %v1097_v61 = vmul.f32 %v2389_v60, %v2385_v52  ;;  %v1324_v6 = vpop.permute.xlu1 %1323 }
 0x456   : > { %2081 = vst.msk [vmem:[%s3194_s30 + $0x8] sm:$0xff] %vm847_vm2, %v1097_v61  ;;  %2194 = vmatmul.mubr.msk.f32.vlgmr.msra.gmra.mrb[6].mxu1 %vm847_vm2, %v1097_v61 }
 0x457   : > { %2202 = vmatpush3.msra.mxu1 %v843_v62  ;;  %2203 = vmatprep.mubr.msk.f32.mxu1 %vm2738_vm0, %v2739_v1 }
 0x458   : > { %2211 = vmatprep.subr.mxu1 %v2739_v1 }
 0x4b5   : > { %v1005_v63 = vpop.f32.mrb[4].mxu1 }
 0x4b6   : > { %v2185_v2 = vpop.f32.mrb[5].mxu1  ;;  %2204 = vmatmul.mubr.msk.f32.vlgmr.msra.gmra.mrb[8].mxu1 %vm847_vm2, %v1005_v63 }
 0x4b7   : > { %2212 = vmatpush3.msra.mxu1 %v1415_v0  ;;  %2213 = vmatprep.mubr.msk.f32.mxu1 %vm2738_vm0, %v2739_v1 }
 0x4b8   : > { %2221 = vmatprep.subr.mxu1 %v2739_v1 }
 0x529   : > { %v1173_v4 = vpop.f32.mrb[6].mxu1 }
 0x52a   : > { %v2195_v5 = vpop.f32.mrb[7].mxu1  ;;  %2199 = vmatmul.mubr.msk.f32.vlgmr.msra.gmra.mrb[6].mxu0 %vm847_vm2, %v1173_v4 }
 0x52b   : > { %2207 = vmatpush3.xpose.msk.msra.mxu0 %vm847_vm2, %v1326_v3  ;;  %2208 = vmatprep.mubr.msk.f32.mxu0 %vm2738_vm0, %v2739_v1 }
 0x52c   : > { %2216 = vmatprep.subr.mxu0 %v2739_v1 }
 0x52e   : > { %2209 = vmatmul.mubr.msk.f32.vlgmr.msra.gmra.mrb[8].mxu0 %vm847_vm2, %v1324_v6 }
 0x52f   : > { %2218 = vmatprep.mubr.msk.f32.mxu0 %vm2738_vm0, %v2739_v1  ;;  %2217 = vmatpush3.msra.mxu0 %v845_v25 }
 0x530   : > { %2226 = vmatprep.subr.mxu0 %v2739_v1 }
 0x589   : > { %v1319_v7 = vpop.f32.mrb[8].mxu1 }
 0x58a   : > { %v2205_v8 = vpop.f32.mrb[9].mxu1 }
 0x5fd   : > { %v1246_v9 = vpop.f32.mrb[6].mxu0 }
 0x5fe   : > { %v1320_v10 = vadd.f32 %v1319_v7, %v1246_v9  ;;  %v2200_v11 = vpop.f32.mrb[7].mxu0 }
 0x601   : > { %v1397_v12 = vpop.f32.mrb[8].mxu0 }
 0x602   : > { %v2210_v13 = vpop.f32.mrb[9].mxu0  ;;  %v1401_v14 = vsel %vm847_vm2, %v1397_v12, -inf }
 0x603   : > { %1402 = vmax.xlane.f32.xlu1 %v1401_v14 }
 0x690   : > { %v1403_v15 = vpop.xlane.xlu1 %1402 }
 0x691   : > { %v1404_v16 = vsub.f32 %v1397_v12, %v1403_v15 }
 0x693   : > { %v1405_v17 = vmul.f32 1.442695, %v1404_v16 }
 0x695   : > { %2390 = vpow2.f32 %v1405_v17 }
 0x69f   : > { %v2391_v18 = vpop.eup %2390 }
 0x6a0   : > { %v1407_v19 = vsel %vm847_vm2, %v2391_v18, 0.0 }
 0x6a1   : > { %1408 = vadd.xlane.f32.xlu0 %v1407_v19 }
 0x6b7   : > { %1564 = vrot.lane.b32.xlu0 %v3166_v31, %s2742_s21 }
 0x72e   : > { %v1409_v21 = vpop.xlane.xlu0 %1408 }
 0x72f   : > { %2392 = vrcp.f32 %v1409_v21 }
 0x732   : > { %v1565_v24 = vpop.permute.xlu0 %1564 }
 0x739   : > { %v2393_v22 = vpop.eup %2392 }
 0x73a   : > { %v1411_v23 = vmul.f32 %v2393_v22, %v2391_v18 }
 0x73c   : > { %2087 = vst.msk [vmem:[%s3194_s30 + $0x10] sm:$0xff] %vm847_vm2, %v1411_v23  ;;  %2214 = vmatmul.mubr.msk.f32.vlgmr.msra.gmra.mrb[10].mxu1 %vm847_vm2, %v1411_v23 }
 0x73d   : > { %2222 = vmatpush3.xpose.msk.msra.mxu1 %vm847_vm2, %v1567_v20  ;;  %2223 = vmatprep.mubr.msk.f32.mxu1 %vm2738_vm0, %v2739_v1 }
 0x73e   : > { %2231 = vmatprep.subr.mxu1 %v2739_v1 }
 0x740   : > { %2224 = vmatmul.mubr.msk.f32.vlgmr.msra.gmra.mrb[12].mxu1 %vm847_vm2, %v1565_v24 }
 0x741   : > { %2233 = vmatprep.mubr.msk.f32.mxu1 %vm2738_vm0, %v2739_v1 }
 0x80f   : > { %v1486_v26 = vpop.f32.mrb[10].mxu1 }
 0x810   : > { %v2215_v27 = vpop.f32.mrb[11].mxu1  ;;  %2219 = vmatmul.mubr.msk.f32.vlgmr.msra.gmra.mrb[10].mxu0 %vm847_vm2, %v1486_v26 }
 0x811   : > { %2228 = vmatprep.mubr.msk.f32.mxu0 %vm2738_vm0, %v2739_v1  ;;  %v846_v1 = vld [vmem:[%s3431_s15 + $0x18] sm:$0xff] }
 0x812   : > { %2232 = vmatpush3.msra.mxu1 %v846_v1 }
 0x813   : > { %v1638_v28 = vpop.f32.mrb[12].mxu1 }
 0x814   : > { %v2225_v29 = vpop.f32.mrb[13].mxu1  ;;  %v1642_v30 = vsel %vm847_vm2, %v1638_v28, -inf }
 0x815   : > { %1643 = vmax.xlane.f32.xlu0 %v1642_v30 }
 0x8a2   : > { %v1644_v31 = vpop.xlane.xlu0 %1643 }
 0x8a3   : > { %v1645_v32 = vsub.f32 %v1638_v28, %v1644_v31 }
 0x8a5   : > { %v1646_v33 = vmul.f32 1.442695, %v1645_v32 }
 0x8a7   : > { %2394 = vpow2.f32 %v1646_v33 }
 0x8b1   : > { %v2395_v34 = vpop.eup %2394 }
 0x8b2   : > { %v1648_v35 = vsel %vm847_vm2, %v2395_v34, 0.0 }
 0x8b3   : > { %1649 = vadd.xlane.f32.xlu1 %v1648_v35 }
 0x8c4   : > { %1655 = vrot.lane.b32.xlu1 %v3180_v36, %s2742_s21  ;;  %s2600_s21 = scalar_lea.vmem %s3266_s27, 512 }
 0x8c5   : > { %p2601_p13 = scmp.ne.s32.totalorder %s3266_s27, %s2600_s21 }
 0x8c7   : > { %p2602_p1 = pnand %p2601_p13, %p3435_p2 }
 0x8c9   : > { %p2603_p12 = pneg %p2602_p1 }
 0x8e3   : > { %v1559_v37 = vpop.f32.mrb[10].mxu0 }
 0x8e4   : > { %v1563_v38 = vadd.f32 %v1559_v37, %v1320_v10  ;;  %v2220_v39 = vpop.f32.mrb[11].mxu0 }
 0x940   : > { %v1650_v40 = vpop.xlane.xlu1 %1649 }
 0x941   : > { %2396 = vrcp.f32 %v1650_v40 }
 0x944   : > { %v1656_v41 = vpop.permute.xlu1 %1655 }
 0x945   : > { %2227 = vmatpush3.msra.mxu0 %v1656_v41 }
 0x94b   : > { %v2397_v42 = vpop.eup %2396 }
 0x94c   : > { %v1652_v43 = vmul.f32 %v2397_v42, %v2395_v34 }
 0x94e   : > { %2092 = vst.msk [vmem:[%s3194_s30 + $0x18] sm:$0xff] %vm847_vm2, %v1652_v43  ;;  %2229 = vmatmul.mubr.msk.f32.vlgmr.msra.gmra.mrb[12].mxu0 %vm847_vm2, %v1652_v43  ;;  %s2606_s30 = scalar_lea.vmem %s2605_s9, 1024 }
 0x94f   : > { %p2608_p9 = scmp.lt.s32.totalorder %s2606_s30, %s2600_s21 }
 0x951   : > { %p2609_p7 = por %p2608_p9, %p2607_p8 }
 0x953   : > { %p2610_p11 = pnand %p2609_p7, %p2603_p12 }
 0xa21   : > { %v1727_v36 = vpop.f32.mrb[12].mxu0 }
 0xa22   : > { %v2230_v44 = vpop.f32.mrb[13].mxu0  ;;  %2234 = vmatmul.mubr.msk.f32.vlgmr.msra.gmra.mrb[14].mxu1 %vm847_vm2, %v1727_v36 }
 0xa23   : > { %2613 = shalt.err (!%p2610_p11)
}
 0xa24   : > { %s2614_s29 = scalar_lea.hbm %s3264_s26, 512  ;;  %s2618_s1 = scalar_lea.hbm %s3434_s18, 1024 }
 0xa25   : > { %p2615_p5 = scmp.ne.s32.totalorder %s3264_s26, %s2614_s29  ;;  %p2619_p0 = scmp.lt.u32.totalorder %s3264_s26, %s3434_s18 }
 0xa26   : > { %p2620_p4 = scmp.lt.u32.totalorder %s2618_s1, %s2614_s29  ;;  %p2622_p13 = scmp.lt.u32.totalorder %s2614_s29, %s3264_s26 }
 0xa27   : > { %p2616_p3 = pnand %p2615_p5, %p3435_p2 }
 0xa28   : > { %p2621_p10 = por %p2620_p4, %p2619_p0 }
 0xa29   : > { %p2617_p6 = pneg %p2616_p3 }
 0xa2a   : > { %p2623_p1 = por %p2622_p13, %p2621_p10 }
 0xa2c   : > { %p2624_p12 = pnand %p2623_p1, %p2617_p6 }
 0xa2e   : > { %2627 = shalt.err (!%p2624_p12)
}
 0xa2f   : > { %s2744_s28 = smov 128   ;;  %s2745_s12 = smov 8  }
 0xa30   : > { %2277 = dma.vmem_to_hbm [thread:$0]  (%p3435_p2), %s3266_s27, 512, %s3264_s26, %s1820_s3, %s2744_s28, %s2744_s28, %s2745_s12  }
 0xa31   : > { %s3436_s21 = sld [smem:[#allocation35_spill]]  ;;  %s2098_s16 = sshll.u32 %s3432_s17, 7 }
 0xa32   : > { %s578_s9 = scalar_lea.vmem [#allocation14], %s3114_s10  ;;  %s3437_s13 = sld [smem:[#allocation36_spill]] }
 0xa33   : > { %s1834_s30 = sshll.u32 %s578_s9, 4  ;;  %s1815_s27 = scalar_lea.sflag [#allocation4], %s3111_s25  ;;  %s3302_s30 = int_to_ptr.vmem [resolvable:$true] %s1834_s30 }
 0xa34   : > { %s2628_s26 = scalar_lea.vmem %s3302_s30, 128  ;;  %s2746_s10 = smov [#allocation14]  }
 0xa35   : > { %p2629_p8 = scmp.ne.s32.totalorder %s3302_s30, %s2628_s26  ;;  %s2632_s17 = sshll.u32 %s2746_s10, 4  ;;  %s2633_s17 = int_to_ptr.vmem [resolvable:$false] %s2632_s17 }
 0xa36   : > { %s2634_s3 = scalar_lea.vmem %s2633_s17, 256  ;;  %p2635_p11 = scmp.lt.s32.totalorder %s3302_s30, %s2633_s17 }
 0xa37   : > { %v2095_v46 = vld [vmem:[%s3436_s21] ss:$0 sm:$0xff]  ;;  %p2630_p9 = pnand %p2629_p8, %p3435_p2  ;;  %p2636_p5 = scmp.lt.s32.totalorder %s2634_s3, %s2628_s26 }
 0xa38   : > { %s3300_s1 = scalar_lea.hbm %s3437_s13, %s2098_s16 }
 0xa39   : > { %p2631_p7 = pneg %p2630_p9  ;;  %p2637_p3 = por %p2636_p5, %p2635_p11 }
 0xa3b   : > { %p2638_p6 = pnand %p2637_p3, %p2631_p7 }
 0xaf5   : > { %v1800_v45 = vpop.f32.mrb[14].mxu1 }
 0xaf6   : > { %v1804_v47 = vadd.f32 %v1800_v45, %v1563_v38  ;;  %v2235_v48 = vpop.f32.mrb[15].mxu1 }
 0xaf8   : > { %v1812_v49 = vadd.f32 %v2095_v46, %v1804_v47 }
 0xafa   : > { %1813 = vst.msk [vmem:[%s578_s9] sm:$0xff] %vm600_vm1, %v1812_v49 }
 0xafb   : > { %2641 = shalt.err (!%p2638_p6)
}
 0xafc   : > { %s2642_s25 = scalar_lea.hbm %s3300_s1, 128  ;;  %s2646_s28 = scalar_lea.hbm %s3437_s13, 256 }
 0xafd   : > { %p2643_p0 = scmp.ne.s32.totalorder %s3300_s1, %s2642_s25  ;;  %p2647_p13 = scmp.lt.u32.totalorder %s3300_s1, %s3437_s13 }
 0xafe   : > { %p2648_p1 = scmp.lt.u32.totalorder %s2646_s28, %s2642_s25  ;;  %p2650_p8 = scmp.lt.u32.totalorder %s2642_s25, %s3300_s1 }
 0xaff   : > { %p2644_p4 = pnand %p2643_p0, %p3435_p2 }
 0xb00   : > { %p2649_p12 = por %p2648_p1, %p2647_p13 }
 0xb01   : > { %p2645_p10 = pneg %p2644_p4 }
 0xb02   : > { %p2651_p9 = por %p2650_p8, %p2649_p12 }
 0xb04   : > { %p2652_p7 = pnand %p2651_p9, %p2645_p10 }
 0xb06   : > { %2655 = shalt.err (!%p2652_p7)
}
 0xb07   : > { %2276 = dma.vmem_to_hbm [thread:$0]  (%p3435_p2), %s3302_s30, 128, %s3300_s1, %s1815_s27  }
 0xb08 PF: > { %s3438_s11 = sld [smem:[#allocation23_spill]]  ;;  %s3439_s21 = sld [smem:[#allocation30_spill]] }
 0xb09   : > { %s3440_s16 = sld [smem:[#allocation26_spill]] }
 0xb0e   : > { %s1863_s9 = sand.u32 1, %s3438_s11   ;;  %p3441_p11 = scmp.ne.s32.totalorder %s3439_s21, 0 }
 0xb0f   : > { %p3442_p5 = scmp.ge.s32.totalorder %s3440_s16, 2  ;;  %s1864_s29 = scalar_lea.sflag [#allocation4], %s1863_s9 }
 0xb11   : > { %p2304_p3 = pnand %p3442_p5, %p3441_p11 }
 0xb13   : > { %2697 = dma.done.wait (!%p2304_p3), %s1864_s29, 128  }
 0xb14   : > { %2699 = vsyncadd (!%p2304_p3), %s1864_s29, 4294967168  ;;  %s1873_s24 = scalar_lea.sflag [#allocation16], %s1863_s9 }
 0xb15   : > { %2701 = dma.done.wait (!%p2304_p3), %s1873_s24, 512  }
 0xb16   : > { %2703 = vsyncadd (!%p2304_p3), %s1873_s24, 4294966784  ;;  %s37_s26 = sadd.s32 1, %s3440_s16   ;;  %s3443_s19 = sld [smem:[#allocation29_spill]] }
 0xb17   : > { %p34_p6 = scmp.ge.s32.totalorder %s37_s26, 4   ;;  %s3444_s24 = sld [smem:[#allocation25_spill]] }
 0xb18   : > { %s3445_s25 = sld [smem:[#allocation27_spill]]  ;;  %s3446_s21 = smov %s2710_s22 }
 0xb19   : > { %s3447_s22 = smov %s2714_s23  ;;  %36 = sbr.rel (!%p34_p6) target bundleno = 20 (0x14), region = 169 }
 0xb1c   : > { %s3448_s23 = smov %s3443_s19 }
 0xb20   :  { %1878 = vsyncpa [#allocation3], 1 }
 0xb21   :  { %1880 = vsyncpa [#allocation3 + $0x1], 1 }
 0xb22   :  { %1881 = vsyncpa [#allocation6], 1 }
 0xb23   :  { %1883 = vsyncpa [#allocation6 + $0x1], 1 }
 0xb24   :  { %1884 = vsyncpa [#allocation9], 1 }
 0xb25   :  { %1885 = vsyncpa [#allocation12], 1 }
 0xb26   :  { %1886 = vsyncpa [#allocation4], 1 }
 0xb27   :  { %1888 = vsyncpa [#allocation4 + $0x1], 1 }
 0xb28   :  { %1889 = vsyncpa [#allocation16], 1 }
 0xb29   :  { %1891 = vsyncpa [#allocation16 + $0x1], 1 }

</bundles_post_ra>
